<compile_context>
chip_gen: v5e
topology: v5e:2x2
jax: 0.10.0
libtpu: 0.0.40
codegen_flags: <defaults>
</compile_context>

<pallas_src>
import functools

import jax
import jax.numpy as jnp
from jax.experimental import pallas as pl
from jax.experimental.pallas import tpu as pltpu


def _bert_embeddings_kernel(ids_ref,        # (B*S,)  int32  SMEM (scalar prefetch)
                            word_hbm,       # (V, H)  f32    HBM  (pl.ANY)
                            pos_ref,        # (TILE_S, H) f32 VMEM
                            gamma_ref,      # (1, H)  f32    VMEM
                            beta_ref,       # (1, H)  f32    VMEM
                            out_ref,        # (TILE_S, H) f32 VMEM (batch dim squeezed)
                            row_buf,        # (TILE_S, H) f32 VMEM scratch
                            sem,            # DMA sems, (TILE_S,)
                            *, seq_len, tile_s, vocab, eps):
    b = pl.program_id(0)
    st = pl.program_id(1)
    base = b * seq_len + st * tile_s          # flat offset of this tile's first token

    # ---- DMA row-gather: start all copies, then wait on all of them. ----
    # (tile_s is small/static here; for production tile sizes use
    #  lax.fori_loop(..., unroll=...) instead of a Python loop.)
    for r in range(tile_s):
        tok = ids_ref[base + r]
        tok = jnp.minimum(jnp.maximum(tok, 0), vocab - 1)   # guard OOB ids
        pltpu.make_async_copy(word_hbm.at[pl.ds(tok, 1), :],
                              row_buf.at[pl.ds(r, 1), :],
                              sem.at[r]).start()
    for r in range(tile_s):
        pltpu.make_async_copy(word_hbm.at[pl.ds(0, 1), :],   # shape-only src for wait
                              row_buf.at[pl.ds(r, 1), :],
                              sem.at[r]).wait()

    # ---- Fused position add + LayerNorm (single-pass statistics). ----
    h = out_ref.shape[-1]
    x = row_buf[...] + pos_ref[...]                          # (tile_s, H)
    s1 = jnp.sum(x, axis=-1, keepdims=True)
    s2 = jnp.sum(x * x, axis=-1, keepdims=True)
    mean = s1 * (1.0 / h)
    var = s2 * (1.0 / h) - mean * mean
    y = (x - mean) * jax.lax.rsqrt(var + eps)
    out_ref[...] = y * gamma_ref[...] + beta_ref[...]


def bert_embeddings(input_ids, word_emb, pos_emb, gamma, beta, *,
                    eps=1e-12, tile_s=None):
    """input_ids: (B, S) int32 -> (B, S, H) float32."""
    B, S = input_ids.shape
    V, H = word_emb.shape
    assert S <= pos_emb.shape[0], "sequence longer than max_position_embeddings"

    if tile_s is None:
        tile_s = S if S <= 512 else 512
    while S % tile_s != 0:          # keep the seq grid exact
        tile_s //= 2
    n_s = S // tile_s

    flat_ids = input_ids.reshape(B * S).astype(jnp.int32)
    pos_slice = pos_emb[:S]
    gamma2 = gamma.reshape(1, H)
    beta2 = beta.reshape(1, H)

    kernel = functools.partial(_bert_embeddings_kernel,
                               seq_len=S, tile_s=tile_s, vocab=V, eps=eps)

    out = pl.pallas_call(
        kernel,
        out_shape=jax.ShapeDtypeStruct((B, S, H), jnp.float32),
        grid_spec=pltpu.PrefetchScalarGridSpec(
            num_scalar_prefetch=1,                 # flat_ids -> SMEM
            grid=(B, n_s),
            in_specs=[
                pl.BlockSpec(memory_space=pl.ANY),                        # word table stays in HBM
                pl.BlockSpec((tile_s, H), lambda b, s, ids: (s, 0)),      # position tile
                pl.BlockSpec((1, H), lambda b, s, ids: (0, 0)),           # gamma
                pl.BlockSpec((1, H), lambda b, s, ids: (0, 0)),           # beta
            ],
            out_specs=pl.BlockSpec((None, tile_s, H),
                                   lambda b, s, ids: (b, s, 0)),
            scratch_shapes=[
                pltpu.VMEM((tile_s, H), jnp.float32),                     # gathered rows
                pltpu.SemaphoreType.DMA((tile_s,)),                       # per-row DMA sems
            ],
        ),
        compiler_params=pltpu.CompilerParams(
            dimension_semantics=("parallel", "parallel")),
    )(flat_ids, word_emb, pos_slice, gamma2, beta2)

    return out


def _reference(input_ids, word_emb, pos_emb, gamma, beta, eps=1e-12):
    S = input_ids.shape[1]
    x = word_emb[input_ids] + pos_emb[:S][None, :, :]
    mean = jnp.mean(x, axis=-1, keepdims=True)
    var = jnp.mean((x - mean) ** 2, axis=-1, keepdims=True)
    return (x - mean) * jax.lax.rsqrt(var + eps) * gamma + beta


if __name__ == "__main__":
    # Synthetic config (mirrors BertEmbeddings __init__ shapes).
    vocab_size = 64
    hidden_dim = 32                   # toy H; real BERT H=768 is lane-dense (multiple of 128)
    max_position_embeddings = 16
    layer_norm_eps = 1e-12

    B, S = 2, 8

    key = jax.random.PRNGKey(0)
    k_ids, k_word, k_pos = jax.random.split(key, 3)

    input_ids = jax.random.randint(k_ids, (B, S), 0, vocab_size, dtype=jnp.int32)
    word_emb = 0.02 * jax.random.normal(k_word, (vocab_size, hidden_dim),
                                        dtype=jnp.float32)
    pos_emb = 0.02 * jax.random.normal(k_pos, (max_position_embeddings, hidden_dim),
                                       dtype=jnp.float32)
    gamma = jnp.ones((hidden_dim,), jnp.float32)   # LayerNorm weight
    beta = jnp.zeros((hidden_dim,), jnp.float32)   # LayerNorm bias

    out = bert_embeddings(input_ids, word_emb, pos_emb, gamma, beta,
                          eps=layer_norm_eps)
    out = jax.block_until_ready(out)

    ref = _reference(input_ids, word_emb, pos_emb, gamma, beta, layer_norm_eps)
    assert out.shape == (B, S, hidden_dim)
    assert jnp.allclose(out, ref, atol=1e-5, rtol=1e-5), "mismatch vs reference"

    print("KERNEL_OK")
</pallas_src>

<mosaic_0001>
module attributes {stable_mosaic.version = 11 : i64} {
  func.func @_bert_embeddings_kernel(%arg0: i32, %arg1: i32, %arg2: memref<16xi32, #tpu.memory_space<smem>>, %arg3: memref<64x32xf32, #tpu.memory_space<any>>, %arg4: memref<8x32xf32, #tpu.memory_space<vmem>>, %arg5: memref<1x32xf32, #tpu.memory_space<vmem>>, %arg6: memref<1x32xf32, #tpu.memory_space<vmem>>, %arg7: memref<1x8x32xf32, #tpu.memory_space<vmem>>, %arg8: memref<8x32xf32, #tpu.memory_space<vmem>>, %arg9: memref<8x!tpu.dma_semaphore, #tpu.memory_space<semaphore_mem>>) attributes {dimension_semantics = [#tpu.dimension_semantics<parallel>, #tpu.dimension_semantics<parallel>], iteration_bounds = array<i64: 2, 1>, scalar_prefetch = 1 : i64, scratch_operands = 2 : i64, tpu.core_type = #tpu.core_type<tc>, window_params = [{}, {transform_indices = @transform_1, window_bounds = array<i64: 8, 32>}, {pipeline_mode = #tpu.pipeline_mode<synchronous>, transform_indices = @transform_2, window_bounds = array<i64: 1, 32>}, {pipeline_mode = #tpu.pipeline_mode<synchronous>, transform_indices = @transform_3, window_bounds = array<i64: 1, 32>}, {transform_indices = @transform_4, window_bounds = array<i64: 1, 8, 32>}]} {
    %c8_i32 = arith.constant 8 : i32
    %0 = arith.muli %arg0, %c8_i32 : i32
    %c8_i32_0 = arith.constant 8 : i32
    %1 = arith.muli %arg1, %c8_i32_0 : i32
    %2 = arith.addi %0, %1 : i32
    %c0_i32 = arith.constant 0 : i32
    %3 = arith.addi %2, %c0_i32 : i32
    %4 = arith.index_cast %3 : i32 to index
    %5 = memref.load %arg2[%4] : memref<16xi32, #tpu.memory_space<smem>>
    %c0_i32_1 = arith.constant 0 : i32
    %6 = arith.maxsi %5, %c0_i32_1 : i32
    %c63_i32 = arith.constant 63 : i32
    %7 = arith.minsi %6, %c63_i32 : i32
    %c0_i32_2 = arith.constant 0 : i32
    %c0_i32_3 = arith.constant 0 : i32
    %8 = tpu.memref_slice %arg3[%7, %c0_i32_3] : memref<64x32xf32, #tpu.memory_space<any>> -> memref<1x32xf32, #tpu.memory_space<any>>
    %c0_i32_4 = arith.constant 0 : i32
    %c0_i32_5 = arith.constant 0 : i32
    %9 = tpu.memref_slice %arg8[%c0_i32_4, %c0_i32_5] : memref<8x32xf32, #tpu.memory_space<vmem>> -> memref<1x32xf32, #tpu.memory_space<vmem>>
    %10 = tpu.memref_slice %arg9[%c0_i32_2] : memref<8x!tpu.dma_semaphore, #tpu.memory_space<semaphore_mem>> -> memref<1x!tpu.dma_semaphore, #tpu.memory_space<semaphore_mem>>
    %11 = tpu.memref_squeeze %10 : memref<1x!tpu.dma_semaphore, #tpu.memory_space<semaphore_mem>> -> memref<!tpu.dma_semaphore, #tpu.memory_space<semaphore_mem>>
    tpu.enqueue_dma source(%8 : memref<1x32xf32, #tpu.memory_space<any>>) target(%9 : memref<1x32xf32, #tpu.memory_space<vmem>>) target_semaphore(%11 : memref<!tpu.dma_semaphore, #tpu.memory_space<semaphore_mem>>)
    %c1_i32 = arith.constant 1 : i32
    %12 = arith.addi %2, %c1_i32 : i32
    %13 = arith.index_cast %12 : i32 to index
    %14 = memref.load %arg2[%13] : memref<16xi32, #tpu.memory_space<smem>>
    %c0_i32_6 = arith.constant 0 : i32
    %15 = arith.maxsi %14, %c0_i32_6 : i32
    %c63_i32_7 = arith.constant 63 : i32
    %16 = arith.minsi %15, %c63_i32_7 : i32
    %c1_i32_8 = arith.constant 1 : i32
    %c0_i32_9 = arith.constant 0 : i32
    %17 = tpu.memref_slice %arg3[%16, %c0_i32_9] : memref<64x32xf32, #tpu.memory_space<any>> -> memref<1x32xf32, #tpu.memory_space<any>>
    %c1_i32_10 = arith.constant 1 : i32
    %c0_i32_11 = arith.constant 0 : i32
    %18 = tpu.memref_slice %arg8[%c1_i32_10, %c0_i32_11] : memref<8x32xf32, #tpu.memory_space<vmem>> -> memref<1x32xf32, #tpu.memory_space<vmem>>
    %19 = tpu.memref_slice %arg9[%c1_i32_8] : memref<8x!tpu.dma_semaphore, #tpu.memory_space<semaphore_mem>> -> memref<1x!tpu.dma_semaphore, #tpu.memory_space<semaphore_mem>>
    %20 = tpu.memref_squeeze %19 : memref<1x!tpu.dma_semaphore, #tpu.memory_space<semaphore_mem>> -> memref<!tpu.dma_semaphore, #tpu.memory_space<semaphore_mem>>
    tpu.enqueue_dma source(%17 : memref<1x32xf32, #tpu.memory_space<any>>) target(%18 : memref<1x32xf32, #tpu.memory_space<vmem>>) target_semaphore(%20 : memref<!tpu.dma_semaphore, #tpu.memory_space<semaphore_mem>>)
    %c2_i32 = arith.constant 2 : i32
    %21 = arith.addi %2, %c2_i32 : i32
    %22 = arith.index_cast %21 : i32 to index
    %23 = memref.load %arg2[%22] : memref<16xi32, #tpu.memory_space<smem>>
    %c0_i32_12 = arith.constant 0 : i32
    %24 = arith.maxsi %23, %c0_i32_12 : i32
    %c63_i32_13 = arith.constant 63 : i32
    %25 = arith.minsi %24, %c63_i32_13 : i32
    %c2_i32_14 = arith.constant 2 : i32
    %c0_i32_15 = arith.constant 0 : i32
    %26 = tpu.memref_slice %arg3[%25, %c0_i32_15] : memref<64x32xf32, #tpu.memory_space<any>> -> memref<1x32xf32, #tpu.memory_space<any>>
    %c2_i32_16 = arith.constant 2 : i32
    %c0_i32_17 = arith.constant 0 : i32
    %27 = tpu.memref_slice %arg8[%c2_i32_16, %c0_i32_17] : memref<8x32xf32, #tpu.memory_space<vmem>> -> memref<1x32xf32, #tpu.memory_space<vmem>>
    %28 = tpu.memref_slice %arg9[%c2_i32_14] : memref<8x!tpu.dma_semaphore, #tpu.memory_space<semaphore_mem>> -> memref<1x!tpu.dma_semaphore, #tpu.memory_space<semaphore_mem>>
    %29 = tpu.memref_squeeze %28 : memref<1x!tpu.dma_semaphore, #tpu.memory_space<semaphore_mem>> -> memref<!tpu.dma_semaphore, #tpu.memory_space<semaphore_mem>>
    tpu.enqueue_dma source(%26 : memref<1x32xf32, #tpu.memory_space<any>>) target(%27 : memref<1x32xf32, #tpu.memory_space<vmem>>) target_semaphore(%29 : memref<!tpu.dma_semaphore, #tpu.memory_space<semaphore_mem>>)
    %c3_i32 = arith.constant 3 : i32
    %30 = arith.addi %2, %c3_i32 : i32
    %31 = arith.index_cast %30 : i32 to index
    %32 = memref.load %arg2[%31] : memref<16xi32, #tpu.memory_space<smem>>
    %c0_i32_18 = arith.constant 0 : i32
    %33 = arith.maxsi %32, %c0_i32_18 : i32
    %c63_i32_19 = arith.constant 63 : i32
    %34 = arith.minsi %33, %c63_i32_19 : i32
    %c3_i32_20 = arith.constant 3 : i32
    %c0_i32_21 = arith.constant 0 : i32
    %35 = tpu.memref_slice %arg3[%34, %c0_i32_21] : memref<64x32xf32, #tpu.memory_space<any>> -> memref<1x32xf32, #tpu.memory_space<any>>
    %c3_i32_22 = arith.constant 3 : i32
    %c0_i32_23 = arith.constant 0 : i32
    %36 = tpu.memref_slice %arg8[%c3_i32_22, %c0_i32_23] : memref<8x32xf32, #tpu.memory_space<vmem>> -> memref<1x32xf32, #tpu.memory_space<vmem>>
    %37 = tpu.memref_slice %arg9[%c3_i32_20] : memref<8x!tpu.dma_semaphore, #tpu.memory_space<semaphore_mem>> -> memref<1x!tpu.dma_semaphore, #tpu.memory_space<semaphore_mem>>
    %38 = tpu.memref_squeeze %37 : memref<1x!tpu.dma_semaphore, #tpu.memory_space<semaphore_mem>> -> memref<!tpu.dma_semaphore, #tpu.memory_space<semaphore_mem>>
    tpu.enqueue_dma source(%35 : memref<1x32xf32, #tpu.memory_space<any>>) target(%36 : memref<1x32xf32, #tpu.memory_space<vmem>>) target_semaphore(%38 : memref<!tpu.dma_semaphore, #tpu.memory_space<semaphore_mem>>)
    %c4_i32 = arith.constant 4 : i32
    %39 = arith.addi %2, %c4_i32 : i32
    %40 = arith.index_cast %39 : i32 to index
    %41 = memref.load %arg2[%40] : memref<16xi32, #tpu.memory_space<smem>>
    %c0_i32_24 = arith.constant 0 : i32
    %42 = arith.maxsi %41, %c0_i32_24 : i32
    %c63_i32_25 = arith.constant 63 : i32
    %43 = arith.minsi %42, %c63_i32_25 : i32
    %c4_i32_26 = arith.constant 4 : i32
    %c0_i32_27 = arith.constant 0 : i32
    %44 = tpu.memref_slice %arg3[%43, %c0_i32_27] : memref<64x32xf32, #tpu.memory_space<any>> -> memref<1x32xf32, #tpu.memory_space<any>>
    %c4_i32_28 = arith.constant 4 : i32
    %c0_i32_29 = arith.constant 0 : i32
    %45 = tpu.memref_slice %arg8[%c4_i32_28, %c0_i32_29] : memref<8x32xf32, #tpu.memory_space<vmem>> -> memref<1x32xf32, #tpu.memory_space<vmem>>
    %46 = tpu.memref_slice %arg9[%c4_i32_26] : memref<8x!tpu.dma_semaphore, #tpu.memory_space<semaphore_mem>> -> memref<1x!tpu.dma_semaphore, #tpu.memory_space<semaphore_mem>>
    %47 = tpu.memref_squeeze %46 : memref<1x!tpu.dma_semaphore, #tpu.memory_space<semaphore_mem>> -> memref<!tpu.dma_semaphore, #tpu.memory_space<semaphore_mem>>
    tpu.enqueue_dma source(%44 : memref<1x32xf32, #tpu.memory_space<any>>) target(%45 : memref<1x32xf32, #tpu.memory_space<vmem>>) target_semaphore(%47 : memref<!tpu.dma_semaphore, #tpu.memory_space<semaphore_mem>>)
    %c5_i32 = arith.constant 5 : i32
    %48 = arith.addi %2, %c5_i32 : i32
    %49 = arith.index_cast %48 : i32 to index
    %50 = memref.load %arg2[%49] : memref<16xi32, #tpu.memory_space<smem>>
    %c0_i32_30 = arith.constant 0 : i32
    %51 = arith.maxsi %50, %c0_i32_30 : i32
    %c63_i32_31 = arith.constant 63 : i32
    %52 = arith.minsi %51, %c63_i32_31 : i32
    %c5_i32_32 = arith.constant 5 : i32
    %c0_i32_33 = arith.constant 0 : i32
    %53 = tpu.memref_slice %arg3[%52, %c0_i32_33] : memref<64x32xf32, #tpu.memory_space<any>> -> memref<1x32xf32, #tpu.memory_space<any>>
    %c5_i32_34 = arith.constant 5 : i32
    %c0_i32_35 = arith.constant 0 : i32
    %54 = tpu.memref_slice %arg8[%c5_i32_34, %c0_i32_35] : memref<8x32xf32, #tpu.memory_space<vmem>> -> memref<1x32xf32, #tpu.memory_space<vmem>>
    %55 = tpu.memref_slice %arg9[%c5_i32_32] : memref<8x!tpu.dma_semaphore, #tpu.memory_space<semaphore_mem>> -> memref<1x!tpu.dma_semaphore, #tpu.memory_space<semaphore_mem>>
    %56 = tpu.memref_squeeze %55 : memref<1x!tpu.dma_semaphore, #tpu.memory_space<semaphore_mem>> -> memref<!tpu.dma_semaphore, #tpu.memory_space<semaphore_mem>>
    tpu.enqueue_dma source(%53 : memref<1x32xf32, #tpu.memory_space<any>>) target(%54 : memref<1x32xf32, #tpu.memory_space<vmem>>) target_semaphore(%56 : memref<!tpu.dma_semaphore, #tpu.memory_space<semaphore_mem>>)
    %c6_i32 = arith.constant 6 : i32
    %57 = arith.addi %2, %c6_i32 : i32
    %58 = arith.index_cast %57 : i32 to index
    %59 = memref.load %arg2[%58] : memref<16xi32, #tpu.memory_space<smem>>
    %c0_i32_36 = arith.constant 0 : i32
    %60 = arith.maxsi %59, %c0_i32_36 : i32
    %c63_i32_37 = arith.constant 63 : i32
    %61 = arith.minsi %60, %c63_i32_37 : i32
    %c6_i32_38 = arith.constant 6 : i32
    %c0_i32_39 = arith.constant 0 : i32
    %62 = tpu.memref_slice %arg3[%61, %c0_i32_39] : memref<64x32xf32, #tpu.memory_space<any>> -> memref<1x32xf32, #tpu.memory_space<any>>
    %c6_i32_40 = arith.constant 6 : i32
    %c0_i32_41 = arith.constant 0 : i32
    %63 = tpu.memref_slice %arg8[%c6_i32_40, %c0_i32_41] : memref<8x32xf32, #tpu.memory_space<vmem>> -> memref<1x32xf32, #tpu.memory_space<vmem>>
    %64 = tpu.memref_slice %arg9[%c6_i32_38] : memref<8x!tpu.dma_semaphore, #tpu.memory_space<semaphore_mem>> -> memref<1x!tpu.dma_semaphore, #tpu.memory_space<semaphore_mem>>
    %65 = tpu.memref_squeeze %64 : memref<1x!tpu.dma_semaphore, #tpu.memory_space<semaphore_mem>> -> memref<!tpu.dma_semaphore, #tpu.memory_space<semaphore_mem>>
    tpu.enqueue_dma source(%62 : memref<1x32xf32, #tpu.memory_space<any>>) target(%63 : memref<1x32xf32, #tpu.memory_space<vmem>>) target_semaphore(%65 : memref<!tpu.dma_semaphore, #tpu.memory_space<semaphore_mem>>)
    %c7_i32 = arith.constant 7 : i32
    %66 = arith.addi %2, %c7_i32 : i32
    %67 = arith.index_cast %66 : i32 to index
    %68 = memref.load %arg2[%67] : memref<16xi32, #tpu.memory_space<smem>>
    %c0_i32_42 = arith.constant 0 : i32
    %69 = arith.maxsi %68, %c0_i32_42 : i32
    %c63_i32_43 = arith.constant 63 : i32
    %70 = arith.minsi %69, %c63_i32_43 : i32
    %c7_i32_44 = arith.constant 7 : i32
    %c0_i32_45 = arith.constant 0 : i32
    %71 = tpu.memref_slice %arg3[%70, %c0_i32_45] : memref<64x32xf32, #tpu.memory_space<any>> -> memref<1x32xf32, #tpu.memory_space<any>>
    %c7_i32_46 = arith.constant 7 : i32
    %c0_i32_47 = arith.constant 0 : i32
    %72 = tpu.memref_slice %arg8[%c7_i32_46, %c0_i32_47] : memref<8x32xf32, #tpu.memory_space<vmem>> -> memref<1x32xf32, #tpu.memory_space<vmem>>
    %73 = tpu.memref_slice %arg9[%c7_i32_44] : memref<8x!tpu.dma_semaphore, #tpu.memory_space<semaphore_mem>> -> memref<1x!tpu.dma_semaphore, #tpu.memory_space<semaphore_mem>>
    %74 = tpu.memref_squeeze %73 : memref<1x!tpu.dma_semaphore, #tpu.memory_space<semaphore_mem>> -> memref<!tpu.dma_semaphore, #tpu.memory_space<semaphore_mem>>
    tpu.enqueue_dma source(%71 : memref<1x32xf32, #tpu.memory_space<any>>) target(%72 : memref<1x32xf32, #tpu.memory_space<vmem>>) target_semaphore(%74 : memref<!tpu.dma_semaphore, #tpu.memory_space<semaphore_mem>>)
    %c0_i32_48 = arith.constant 0 : i32
    %c0_i32_49 = arith.constant 0 : i32
    %c0_i32_50 = arith.constant 0 : i32
    %75 = tpu.memref_slice %arg3[%c0_i32_49, %c0_i32_50] : memref<64x32xf32, #tpu.memory_space<any>> -> memref<1x32xf32, #tpu.memory_space<any>>
    %c0_i32_51 = arith.constant 0 : i32
    %c0_i32_52 = arith.constant 0 : i32
    %76 = tpu.memref_slice %arg8[%c0_i32_51, %c0_i32_52] : memref<8x32xf32, #tpu.memory_space<vmem>> -> memref<1x32xf32, #tpu.memory_space<vmem>>
    %77 = tpu.memref_slice %arg9[%c0_i32_48] : memref<8x!tpu.dma_semaphore, #tpu.memory_space<semaphore_mem>> -> memref<1x!tpu.dma_semaphore, #tpu.memory_space<semaphore_mem>>
    %78 = tpu.memref_squeeze %77 : memref<1x!tpu.dma_semaphore, #tpu.memory_space<semaphore_mem>> -> memref<!tpu.dma_semaphore, #tpu.memory_space<semaphore_mem>>
    tpu.wait_dma2 semaphore(%78 : memref<!tpu.dma_semaphore, #tpu.memory_space<semaphore_mem>>) src(%75 : memref<1x32xf32, #tpu.memory_space<any>>) dst(%76 : memref<1x32xf32, #tpu.memory_space<vmem>>)
    %c1_i32_53 = arith.constant 1 : i32
    %c0_i32_54 = arith.constant 0 : i32
    %c0_i32_55 = arith.constant 0 : i32
    %79 = tpu.memref_slice %arg3[%c0_i32_54, %c0_i32_55] : memref<64x32xf32, #tpu.memory_space<any>> -> memref<1x32xf32, #tpu.memory_space<any>>
    %c1_i32_56 = arith.constant 1 : i32
    %c0_i32_57 = arith.constant 0 : i32
    %80 = tpu.memref_slice %arg8[%c1_i32_56, %c0_i32_57] : memref<8x32xf32, #tpu.memory_space<vmem>> -> memref<1x32xf32, #tpu.memory_space<vmem>>
    %81 = tpu.memref_slice %arg9[%c1_i32_53] : memref<8x!tpu.dma_semaphore, #tpu.memory_space<semaphore_mem>> -> memref<1x!tpu.dma_semaphore, #tpu.memory_space<semaphore_mem>>
    %82 = tpu.memref_squeeze %81 : memref<1x!tpu.dma_semaphore, #tpu.memory_space<semaphore_mem>> -> memref<!tpu.dma_semaphore, #tpu.memory_space<semaphore_mem>>
    tpu.wait_dma2 semaphore(%82 : memref<!tpu.dma_semaphore, #tpu.memory_space<semaphore_mem>>) src(%79 : memref<1x32xf32, #tpu.memory_space<any>>) dst(%80 : memref<1x32xf32, #tpu.memory_space<vmem>>)
    %c2_i32_58 = arith.constant 2 : i32
    %c0_i32_59 = arith.constant 0 : i32
    %c0_i32_60 = arith.constant 0 : i32
    %83 = tpu.memref_slice %arg3[%c0_i32_59, %c0_i32_60] : memref<64x32xf32, #tpu.memory_space<any>> -> memref<1x32xf32, #tpu.memory_space<any>>
    %c2_i32_61 = arith.constant 2 : i32
    %c0_i32_62 = arith.constant 0 : i32
    %84 = tpu.memref_slice %arg8[%c2_i32_61, %c0_i32_62] : memref<8x32xf32, #tpu.memory_space<vmem>> -> memref<1x32xf32, #tpu.memory_space<vmem>>
    %85 = tpu.memref_slice %arg9[%c2_i32_58] : memref<8x!tpu.dma_semaphore, #tpu.memory_space<semaphore_mem>> -> memref<1x!tpu.dma_semaphore, #tpu.memory_space<semaphore_mem>>
    %86 = tpu.memref_squeeze %85 : memref<1x!tpu.dma_semaphore, #tpu.memory_space<semaphore_mem>> -> memref<!tpu.dma_semaphore, #tpu.memory_space<semaphore_mem>>
    tpu.wait_dma2 semaphore(%86 : memref<!tpu.dma_semaphore, #tpu.memory_space<semaphore_mem>>) src(%83 : memref<1x32xf32, #tpu.memory_space<any>>) dst(%84 : memref<1x32xf32, #tpu.memory_space<vmem>>)
    %c3_i32_63 = arith.constant 3 : i32
    %c0_i32_64 = arith.constant 0 : i32
    %c0_i32_65 = arith.constant 0 : i32
    %87 = tpu.memref_slice %arg3[%c0_i32_64, %c0_i32_65] : memref<64x32xf32, #tpu.memory_space<any>> -> memref<1x32xf32, #tpu.memory_space<any>>
    %c3_i32_66 = arith.constant 3 : i32
    %c0_i32_67 = arith.constant 0 : i32
    %88 = tpu.memref_slice %arg8[%c3_i32_66, %c0_i32_67] : memref<8x32xf32, #tpu.memory_space<vmem>> -> memref<1x32xf32, #tpu.memory_space<vmem>>
    %89 = tpu.memref_slice %arg9[%c3_i32_63] : memref<8x!tpu.dma_semaphore, #tpu.memory_space<semaphore_mem>> -> memref<1x!tpu.dma_semaphore, #tpu.memory_space<semaphore_mem>>
    %90 = tpu.memref_squeeze %89 : memref<1x!tpu.dma_semaphore, #tpu.memory_space<semaphore_mem>> -> memref<!tpu.dma_semaphore, #tpu.memory_space<semaphore_mem>>
    tpu.wait_dma2 semaphore(%90 : memref<!tpu.dma_semaphore, #tpu.memory_space<semaphore_mem>>) src(%87 : memref<1x32xf32, #tpu.memory_space<any>>) dst(%88 : memref<1x32xf32, #tpu.memory_space<vmem>>)
    %c4_i32_68 = arith.constant 4 : i32
    %c0_i32_69 = arith.constant 0 : i32
    %c0_i32_70 = arith.constant 0 : i32
    %91 = tpu.memref_slice %arg3[%c0_i32_69, %c0_i32_70] : memref<64x32xf32, #tpu.memory_space<any>> -> memref<1x32xf32, #tpu.memory_space<any>>
    %c4_i32_71 = arith.constant 4 : i32
    %c0_i32_72 = arith.constant 0 : i32
    %92 = tpu.memref_slice %arg8[%c4_i32_71, %c0_i32_72] : memref<8x32xf32, #tpu.memory_space<vmem>> -> memref<1x32xf32, #tpu.memory_space<vmem>>
    %93 = tpu.memref_slice %arg9[%c4_i32_68] : memref<8x!tpu.dma_semaphore, #tpu.memory_space<semaphore_mem>> -> memref<1x!tpu.dma_semaphore, #tpu.memory_space<semaphore_mem>>
    %94 = tpu.memref_squeeze %93 : memref<1x!tpu.dma_semaphore, #tpu.memory_space<semaphore_mem>> -> memref<!tpu.dma_semaphore, #tpu.memory_space<semaphore_mem>>
    tpu.wait_dma2 semaphore(%94 : memref<!tpu.dma_semaphore, #tpu.memory_space<semaphore_mem>>) src(%91 : memref<1x32xf32, #tpu.memory_space<any>>) dst(%92 : memref<1x32xf32, #tpu.memory_space<vmem>>)
    %c5_i32_73 = arith.constant 5 : i32
    %c0_i32_74 = arith.constant 0 : i32
    %c0_i32_75 = arith.constant 0 : i32
    %95 = tpu.memref_slice %arg3[%c0_i32_74, %c0_i32_75] : memref<64x32xf32, #tpu.memory_space<any>> -> memref<1x32xf32, #tpu.memory_space<any>>
    %c5_i32_76 = arith.constant 5 : i32
    %c0_i32_77 = arith.constant 0 : i32
    %96 = tpu.memref_slice %arg8[%c5_i32_76, %c0_i32_77] : memref<8x32xf32, #tpu.memory_space<vmem>> -> memref<1x32xf32, #tpu.memory_space<vmem>>
    %97 = tpu.memref_slice %arg9[%c5_i32_73] : memref<8x!tpu.dma_semaphore, #tpu.memory_space<semaphore_mem>> -> memref<1x!tpu.dma_semaphore, #tpu.memory_space<semaphore_mem>>
    %98 = tpu.memref_squeeze %97 : memref<1x!tpu.dma_semaphore, #tpu.memory_space<semaphore_mem>> -> memref<!tpu.dma_semaphore, #tpu.memory_space<semaphore_mem>>
    tpu.wait_dma2 semaphore(%98 : memref<!tpu.dma_semaphore, #tpu.memory_space<semaphore_mem>>) src(%95 : memref<1x32xf32, #tpu.memory_space<any>>) dst(%96 : memref<1x32xf32, #tpu.memory_space<vmem>>)
    %c6_i32_78 = arith.constant 6 : i32
    %c0_i32_79 = arith.constant 0 : i32
    %c0_i32_80 = arith.constant 0 : i32
    %99 = tpu.memref_slice %arg3[%c0_i32_79, %c0_i32_80] : memref<64x32xf32, #tpu.memory_space<any>> -> memref<1x32xf32, #tpu.memory_space<any>>
    %c6_i32_81 = arith.constant 6 : i32
    %c0_i32_82 = arith.constant 0 : i32
    %100 = tpu.memref_slice %arg8[%c6_i32_81, %c0_i32_82] : memref<8x32xf32, #tpu.memory_space<vmem>> -> memref<1x32xf32, #tpu.memory_space<vmem>>
    %101 = tpu.memref_slice %arg9[%c6_i32_78] : memref<8x!tpu.dma_semaphore, #tpu.memory_space<semaphore_mem>> -> memref<1x!tpu.dma_semaphore, #tpu.memory_space<semaphore_mem>>
    %102 = tpu.memref_squeeze %101 : memref<1x!tpu.dma_semaphore, #tpu.memory_space<semaphore_mem>> -> memref<!tpu.dma_semaphore, #tpu.memory_space<semaphore_mem>>
    tpu.wait_dma2 semaphore(%102 : memref<!tpu.dma_semaphore, #tpu.memory_space<semaphore_mem>>) src(%99 : memref<1x32xf32, #tpu.memory_space<any>>) dst(%100 : memref<1x32xf32, #tpu.memory_space<vmem>>)
    %c7_i32_83 = arith.constant 7 : i32
    %c0_i32_84 = arith.constant 0 : i32
    %c0_i32_85 = arith.constant 0 : i32
    %103 = tpu.memref_slice %arg3[%c0_i32_84, %c0_i32_85] : memref<64x32xf32, #tpu.memory_space<any>> -> memref<1x32xf32, #tpu.memory_space<any>>
    %c7_i32_86 = arith.constant 7 : i32
    %c0_i32_87 = arith.constant 0 : i32
    %104 = tpu.memref_slice %arg8[%c7_i32_86, %c0_i32_87] : memref<8x32xf32, #tpu.memory_space<vmem>> -> memref<1x32xf32, #tpu.memory_space<vmem>>
    %105 = tpu.memref_slice %arg9[%c7_i32_83] : memref<8x!tpu.dma_semaphore, #tpu.memory_space<semaphore_mem>> -> memref<1x!tpu.dma_semaphore, #tpu.memory_space<semaphore_mem>>
    %106 = tpu.memref_squeeze %105 : memref<1x!tpu.dma_semaphore, #tpu.memory_space<semaphore_mem>> -> memref<!tpu.dma_semaphore, #tpu.memory_space<semaphore_mem>>
    tpu.wait_dma2 semaphore(%106 : memref<!tpu.dma_semaphore, #tpu.memory_space<semaphore_mem>>) src(%103 : memref<1x32xf32, #tpu.memory_space<any>>) dst(%104 : memref<1x32xf32, #tpu.memory_space<vmem>>)
    %c0 = arith.constant 0 : index
    %c0_88 = arith.constant 0 : index
    %107 = vector.load %arg8[%c0, %c0_88] : memref<8x32xf32, #tpu.memory_space<vmem>>, vector<8x32xf32>
    %c0_89 = arith.constant 0 : index
    %c0_90 = arith.constant 0 : index
    %108 = vector.load %arg4[%c0_89, %c0_90] : memref<8x32xf32, #tpu.memory_space<vmem>>, vector<8x32xf32>
    %109 = arith.addf %107, %108 : vector<8x32xf32>
    %cst = arith.constant dense<0.000000e+00> : vector<8xf32>
    %110 = vector.multi_reduction <add>, %109, %cst [1] : vector<8x32xf32> to vector<8xf32>
    %111 = vector.shape_cast %110 : vector<8xf32> to vector<8x1xf32>
    %112 = arith.mulf %109, %109 : vector<8x32xf32>
    %cst_91 = arith.constant dense<0.000000e+00> : vector<8xf32>
    %113 = vector.multi_reduction <add>, %112, %cst_91 [1] : vector<8x32xf32> to vector<8xf32>
    %114 = vector.shape_cast %113 : vector<8xf32> to vector<8x1xf32>
    %cst_92 = arith.constant 3.125000e-02 : f32
    %115 = vector.broadcast %cst_92 : f32 to vector<8x1xf32>
    %116 = arith.mulf %111, %115 : vector<8x1xf32>
    %cst_93 = arith.constant 3.125000e-02 : f32
    %117 = vector.broadcast %cst_93 : f32 to vector<8x1xf32>
    %118 = arith.mulf %114, %117 : vector<8x1xf32>
    %119 = arith.mulf %116, %116 : vector<8x1xf32>
    %120 = arith.subf %118, %119 : vector<8x1xf32>
    %121 = vector.broadcast %116 : vector<8x1xf32> to vector<8x32xf32>
    %122 = arith.subf %109, %121 : vector<8x32xf32>
    %cst_94 = arith.constant 9.99999996E-13 : f32
    %123 = vector.broadcast %cst_94 : f32 to vector<8x1xf32>
    %124 = arith.addf %120, %123 : vector<8x1xf32>
    %125 = math.rsqrt %124 : vector<8x1xf32>
    %126 = vector.broadcast %125 : vector<8x1xf32> to vector<8x32xf32>
    %127 = arith.mulf %122, %126 : vector<8x32xf32>
    %c0_95 = arith.constant 0 : index
    %c0_96 = arith.constant 0 : index
    %128 = vector.load %arg5[%c0_95, %c0_96] : memref<1x32xf32, #tpu.memory_space<vmem>>, vector<1x32xf32>
    %129 = vector.broadcast %128 : vector<1x32xf32> to vector<8x32xf32>
    %130 = arith.mulf %127, %129 : vector<8x32xf32>
    %c0_97 = arith.constant 0 : index
    %c0_98 = arith.constant 0 : index
    %131 = vector.load %arg6[%c0_97, %c0_98] : memref<1x32xf32, #tpu.memory_space<vmem>>, vector<1x32xf32>
    %132 = vector.broadcast %131 : vector<1x32xf32> to vector<8x32xf32>
    %133 = arith.addf %130, %132 : vector<8x32xf32>
    %c0_99 = arith.constant 0 : index
    %c0_100 = arith.constant 0 : index
    %c0_101 = arith.constant 0 : index
    %134 = vector.load %arg7[%c0_99, %c0_100, %c0_101] : memref<1x8x32xf32, #tpu.memory_space<vmem>>, vector<1x8x32xf32>
    %135 = vector.shape_cast %134 : vector<1x8x32xf32> to vector<8x32xf32>
    %136 = vector.shape_cast %133 : vector<8x32xf32> to vector<1x8x32xf32>
    tpu.vector_store %arg7[%c0_99, %c0_100, %c0_101], %136 {strides = array<i32>} : memref<1x8x32xf32, #tpu.memory_space<vmem>>, vector<1x8x32xf32>,
    return
  }
  func.func @transform_1(%arg0: i32, %arg1: i32, %arg2: memref<16xi32, #tpu.memory_space<smem>>) -> (i32, i32) {
    %c0_i32 = arith.constant 0 : i32
    %c0_i32_0 = arith.constant 0 : i32
    return %arg1, %c0_i32 : i32, i32
  }
  func.func @transform_2(%arg0: i32, %arg1: i32, %arg2: memref<16xi32, #tpu.memory_space<smem>>) -> (i32, i32) {
    %c0_i32 = arith.constant 0 : i32
    %c0_i32_0 = arith.constant 0 : i32
    %c0_i32_1 = arith.constant 0 : i32
    return %c0_i32, %c0_i32_0 : i32, i32
  }
  func.func @transform_3(%arg0: i32, %arg1: i32, %arg2: memref<16xi32, #tpu.memory_space<smem>>) -> (i32, i32) {
    %c0_i32 = arith.constant 0 : i32
    %c0_i32_0 = arith.constant 0 : i32
    %c0_i32_1 = arith.constant 0 : i32
    return %c0_i32, %c0_i32_0 : i32, i32
  }
  func.func @transform_4(%arg0: i32, %arg1: i32, %arg2: memref<16xi32, #tpu.memory_space<smem>>) -> (i32, i32, i32) {
    %c0_i32 = arith.constant 0 : i32
    %c0_i32_0 = arith.constant 0 : i32
    return %arg0, %arg1, %c0_i32 : i32, i32, i32
  }
}

</mosaic_0001>

<bundles_post_ra>
// kernel: tpu_custom_call.1
= control target key start
LH: loop header
LB: loop body
LE: loop exit
PB: predicated region body
PF: predicated region fallthrough
CT: control target
= control target key end

     0   :  { %s1018_s21 = smov [#allocation5]   ;;  %s1199_s0 = inlined_call_operand.vmem [shape: s32[16], index: 0, kind: input, shape index: {}]   ;;  %s1200_s1 = inlined_call_operand.vmem [shape: f32[64,32], index: 1, kind: input, shape index: {}]   ;;  %s1201_s2 = inlined_call_operand.vmem [shape: f32[8,32], index: 2, kind: input, shape index: {}]   ;;  %s1202_s3 = inlined_call_operand.vmem [shape: f32[1,32], index: 3, kind: input, shape index: {}]   ;;  %s1203_s4 = inlined_call_operand.vmem [shape: f32[1,32], index: 4, kind: input, shape index: {}]   ;;  %s1204_s5 = inlined_call_operand.hbm [shape: f32[2,8,32], index: 5, kind: output, shape index: {}]  }
   0x1   :  { %s11_s20 = sshll.u32 %s1199_s0, 4  ;;  %s12_s20 = int_to_ptr.vmem [resolvable:$true] %s11_s20 }
   0x2   :  { %14 = dma.vmem_to_smem %s12_s20, 16, %s1018_s21, [#allocation4] }
   0x3   :  { %972 = dma.done.wait [#allocation4], 16 }
   0x4   :  { %973 = vsyncadd [#allocation4], 4294967280 }
   0x5   :  { %17 = sfence }
   0x6   :  { %18 = vsyncpa [#allocation7], 0 }
   0x7   :  { %20 = vsyncpa [#allocation7 + $0x1], 0  ;;  %s1052_s22 = smov 0   ;;  %s1054_s23 = smov 0  }
   0x8   :  { %s1056_s24 = smov 0   ;;  %s1058_s25 = smov 0  }
   0x9   :  { %s1060_s26 = smov 0   ;;  %s1062_s27 = smov 0  }
   0xa LB: > { %s773_s0 = sadd.s32 4294967295, %s1016_s27   ;;  %s774_s28 = sadd.s32 4294967294, %s1016_s27   ;;  %s1016_s27 = sphi %s1062_s27, %s26_s27   ;;  %s1012_s26 = sphi %s1060_s26, %s1211_s26   ;;  %s1008_s25 = sphi %s1058_s25, %s1210_s25   ;;  %s1004_s24 = sphi %s1056_s24, %s1209_s24   ;;  %s1000_s23 = sphi %s1054_s23, %s1208_s23   ;;  %s996_s22 = sphi %s1052_s22, %s1207_s22  }
   0xb   : > { %s38_s29 = sadd.s32 1, %s1012_s26  ;;  %s115_s30 = sadd.s32 1, %s1004_s24 }
   0xc   : > { %p40_p0 = scmp.ge.s32.totalorder %s38_s29, 2  ;;  %p125_p1 = scmp.ne.s32.totalorder %s1004_s24, %s1000_s23 }
   0xd   : > { %p126_p2 = scmp.eq.s32.totalorder %s773_s0, 1  ;;  %p131_p3 = scmp.ne.s32.totalorder %s1000_s23, %s996_s22 }
   0xe   : > { %s1213_s29 = smov (%p40_p0, %s38_s29), 0  ;;  %p132_p5 = scmp.eq.s32.totalorder %s774_s28, 1 }
   0xf   : > { %p1090_p4 = por %p126_p2, %p125_p1  ;;  %s110_s7 = ssub.s32 %s1012_s26, %s1213_s29 }
  0x10   : > { %p777_p6 = scmp.ge.s32.totalorder %s1016_s27, 1  ;;  %p113_p7 = scmp.eq.s32.totalorder %s110_s7, 0 }
  0x11   : > { %p1097_p8 = por %p132_p5, %p131_p3  ;;  %p163_p9 = scmp.lt.s32.totalorder %s1016_s27, 3 }
  0x12   : > { %s1103_s9 = scalar_select %p113_p7, %s1004_s24, %s115_s30  }
  0x13   : > { %p164_p10 = pnand %p777_p6, %p163_p9 }
  0x14   : > { %s183_s10 = sand.u32 (!%p164_p10), 1, %s1000_s23   ;;  %s1106_s11 = sshll.u32 (!%p164_p10), %s1008_s25, 3 }
  0x15   : > { %167 = sbr.rel (%p164_p10) target bundleno = 311 (0x137), region = 32  ;;  %s1110_s12 = sshll.u32 (!%p164_p10), %s183_s10, 3 }
  0x16   : > { %s193_s13 = sld [smem:[#allocation5 + %s1106_s11]] (!%p164_p10)  ;;  %s185_s17 = scalar_lea.vmem (!%p164_p10), [#allocation6], %s1110_s12 }
  0x1c   : > { %p194_p11 = scmp.gt.s32.totalorder %s193_s13, 0  ;;  %p780_p12 = scmp.lt.s32.totalorder %s193_s13, 63 }
  0x1e   : > { %s1215_s13 = smov (!%p194_p11, %s193_s13), 0 }
  0x1f   : > { %s1217_s13 = smov (!%p780_p12, %s1215_s13), 63 }
  0x20   : > { %s198_s16 = scalar_lea.vmem %s1200_s1, %s1217_s13 }
  0x21   : > { %v213_v0 = vld [vmem:[%s198_s16] sm:$0x1] }
  0x22   : > { %214 = vst [vmem:[#allocation2] sm:$0x1] %v213_v0 }
  0x23   : > { %232 = vsyncadd [#allocation3], 16  ;;  %s233_s18 = sadd.s32 1, %s1106_s11 }
  0x24   : > { %s234_s19 = sld [smem:[#allocation5 + %s233_s18]] }
  0x2a   : > { %p235_p13 = scmp.gt.s32.totalorder %s234_s19, 0  ;;  %p785_p0 = scmp.lt.s32.totalorder %s234_s19, 63 }
  0x2c   : > { %s1219_s19 = smov (!%p235_p13, %s234_s19), 0 }
  0x2d   : > { %s1221_s19 = smov (!%p785_p0, %s1219_s19), 63 }
  0x2e   : > { %s239_s25 = scalar_lea.vmem %s1200_s1, %s1221_s19 }
  0x2f   : > { %v256_v1 = vld [vmem:[%s239_s25] sm:$0x1] }
  0x30   : > { %257 = vst [vmem:[#allocation2 + $0x1] sm:$0x1] %v256_v1 }
  0x31   : > { %275 = vsyncadd [#allocation3 + $0x1], 16  ;;  %s276_s0 = sadd.s32 2, %s1106_s11 }
  0x32   : > { %s277_s28 = sld [smem:[#allocation5 + %s276_s0]] }
  0x38   : > { %p278_p1 = scmp.gt.s32.totalorder %s277_s28, 0  ;;  %p790_p2 = scmp.lt.s32.totalorder %s277_s28, 63 }
  0x3a   : > { %s1223_s28 = smov (!%p278_p1, %s277_s28), 0 }
  0x3b   : > { %s1225_s28 = smov (!%p790_p2, %s1223_s28), 63 }
  0x3c   : > { %s282_s13 = scalar_lea.vmem %s1200_s1, %s1225_s28 }
  0x3d   : > { %v299_v2 = vld [vmem:[%s282_s13] sm:$0x1] }
  0x3e   : > { %300 = vst [vmem:[#allocation2 + $0x2] sm:$0x1] %v299_v2 }
  0x3f   : > { %318 = vsyncadd [#allocation3 + $0x2], 16  ;;  %s319_s14 = sadd.s32 3, %s1106_s11 }
  0x40   : > { %s320_s15 = sld [smem:[#allocation5 + %s319_s14]] }
  0x46   : > { %p321_p3 = scmp.gt.s32.totalorder %s320_s15, 0  ;;  %p795_p5 = scmp.lt.s32.totalorder %s320_s15, 63 }
  0x48   : > { %s1227_s15 = smov (!%p321_p3, %s320_s15), 0 }
  0x49   : > { %s1229_s15 = smov (!%p795_p5, %s1227_s15), 63 }
  0x4a   : > { %s325_s19 = scalar_lea.vmem %s1200_s1, %s1229_s15 }
  0x4b   : > { %v342_v3 = vld [vmem:[%s325_s19] sm:$0x1] }
  0x4c   : > { %343 = vst [vmem:[#allocation2 + $0x3] sm:$0x1] %v342_v3 }
  0x4d   : > { %361 = vsyncadd [#allocation3 + $0x3], 16  ;;  %s362_s20 = sadd.s32 4, %s1106_s11 }
  0x4e   : > { %s363_s21 = sld [smem:[#allocation5 + %s362_s20]] }
  0x54   : > { %p364_p6 = scmp.gt.s32.totalorder %s363_s21, 0  ;;  %p800_p7 = scmp.lt.s32.totalorder %s363_s21, 63 }
  0x56   : > { %s1231_s21 = smov (!%p364_p6, %s363_s21), 0 }
  0x57   : > { %s1233_s21 = smov (!%p800_p7, %s1231_s21), 63 }
  0x58   : > { %s368_s28 = scalar_lea.vmem %s1200_s1, %s1233_s21 }
  0x59   : > { %v385_v4 = vld [vmem:[%s368_s28] sm:$0x1] }
  0x5a   : > { %386 = vst [vmem:[#allocation2 + $0x4] sm:$0x1] %v385_v4 }
  0x5b   : > { %404 = vsyncadd [#allocation3 + $0x4], 16  ;;  %s405_s30 = sadd.s32 5, %s1106_s11 }
  0x5c   : > { %s406_s7 = sld [smem:[#allocation5 + %s405_s30]] }
  0x62   : > { %p407_p9 = scmp.gt.s32.totalorder %s406_s7, 0  ;;  %p805_p10 = scmp.lt.s32.totalorder %s406_s7, 63 }
  0x64   : > { %s1235_s7 = smov (!%p407_p9, %s406_s7), 0 }
  0x65   : > { %s1237_s7 = smov (!%p805_p10, %s1235_s7), 63 }
  0x66   : > { %s411_s15 = scalar_lea.vmem %s1200_s1, %s1237_s7 }
  0x67   : > { %v428_v5 = vld [vmem:[%s411_s15] sm:$0x1] }
  0x68   : > { %429 = vst [vmem:[#allocation2 + $0x5] sm:$0x1] %v428_v5 }
  0x69   : > { %447 = vsyncadd [#allocation3 + $0x5], 16  ;;  %s448_s16 = sadd.s32 6, %s1106_s11 }
  0x6a   : > { %s449_s18 = sld [smem:[#allocation5 + %s448_s16]] }
  0x70   : > { %p450_p11 = scmp.gt.s32.totalorder %s449_s18, 0  ;;  %p810_p12 = scmp.lt.s32.totalorder %s449_s18, 63 }
  0x72   : > { %s1239_s18 = smov (!%p450_p11, %s449_s18), 0 }
  0x73   : > { %s1241_s18 = smov (!%p810_p12, %s1239_s18), 63 }
  0x74   : > { %s454_s21 = scalar_lea.vmem %s1200_s1, %s1241_s18 }
  0x75   : > { %v471_v6 = vld [vmem:[%s454_s21] sm:$0x1] }
  0x76   : > { %472 = vst [vmem:[#allocation2 + $0x6] sm:$0x1] %v471_v6 }
  0x77   : > { %490 = vsyncadd [#allocation3 + $0x6], 16  ;;  %s491_s25 = sadd.s32 7, %s1106_s11 }
  0x78   : > { %s492_s0 = sld [smem:[#allocation5 + %s491_s25]] }
  0x7e   : > { %p493_p13 = scmp.gt.s32.totalorder %s492_s0, 0  ;;  %p815_p0 = scmp.lt.s32.totalorder %s492_s0, 63 }
  0x80   : > { %s1243_s0 = smov (!%p493_p13, %s492_s0), 0 }
  0x81   : > { %s1245_s0 = smov (!%p815_p0, %s1243_s0), 63 }
  0x82   : > { %s497_s7 = scalar_lea.vmem %s1200_s1, %s1245_s0 }
  0x83   : > { %v514_v7 = vld [vmem:[%s497_s7] sm:$0x1] }
  0x84   : > { %515 = vst [vmem:[#allocation2 + $0x7] sm:$0x1] %v514_v7 }
  0x85   : > { %533 = vsyncadd [#allocation3 + $0x7], 16 }
  0x86   : > { %974 = dma.done.wait [#allocation3], 16 }
  0x87   : > { %975 = vsyncadd [#allocation3], 4294967280 }
  0x88   : > { %976 = dma.done.wait [#allocation3 + $0x1], 16 }
  0x89   : > { %977 = vsyncadd [#allocation3 + $0x1], 4294967280 }
  0x8a   : > { %978 = dma.done.wait [#allocation3 + $0x2], 16 }
  0x8b   : > { %979 = vsyncadd [#allocation3 + $0x2], 4294967280 }
  0x8c   : > { %980 = dma.done.wait [#allocation3 + $0x3], 16 }
  0x8d   : > { %981 = vsyncadd [#allocation3 + $0x3], 4294967280 }
  0x8e   : > { %982 = dma.done.wait [#allocation3 + $0x4], 16 }
  0x8f   : > { %983 = vsyncadd [#allocation3 + $0x4], 4294967280 }
  0x90   : > { %984 = dma.done.wait [#allocation3 + $0x5], 16 }
  0x91   : > { %985 = vsyncadd [#allocation3 + $0x5], 4294967280 }
  0x92   : > { %986 = dma.done.wait [#allocation3 + $0x6], 16 }
  0x93   : > { %987 = vsyncadd [#allocation3 + $0x6], 4294967280 }
  0x94   : > { %988 = dma.done.wait [#allocation3 + $0x7], 16 }
  0x95   : > { %989 = vsyncadd [#allocation3 + $0x7], 4294967280  ;;  %v551_v8 = vld [vmem:[#allocation2] sm:$0xff]  ;;  %vm554_vm0 = vcmask 261120   ;;  %s602_s20 = scalar_lea.hbm %s1204_s5, %s1106_s11  ;;  %s604_s0 = sshll.u32 %s185_s17, 4  ;;  %s605_s0 = int_to_ptr.vmem [resolvable:$true] %s604_s0 }
  0x96   : > { %v552_v9 = vld [vmem:[%s1201_s2] sm:$0xff]  ;;  %s606_s28 = sshll.u32 %s602_s20, 4  ;;  %s591_s30 = scalar_lea.sflag [#allocation7], %s183_s10  ;;  %s607_s28 = int_to_ptr.hbm [resolvable:$true] %s606_s28 }
  0x97   : > { %v553_v10 = vadd.f32 %v552_v9, %v551_v8  ;;  %v904_v28 = vld [vmem:[%s1202_s3] ss:$0 sm:$0xff]  ;;  %s934_s11 = sshra.s32 %s607_s28, 4  ;;  %s940_s15 = scalar_lea.hbm %s1204_s5, 16  ;;  %s935_s11 = int_to_ptr.hbm [resolvable:$true] %s934_s11 }
  0x98   : > { %v905_v31 = vld [vmem:[%s1203_s4] ss:$0 sm:$0xff]  ;;  %s936_s7 = scalar_lea.hbm %s935_s11, 8  ;;  %p941_p5 = scmp.lt.s32.totalorder %s935_s11, %s1204_s5 }
  0x99   : > { %v555_v11 = vsel %vm554_vm0, %v553_v10, 0.0  ;;  %v558_v12 = vmul.f32 %v553_v10, %v553_v10  ;;  %p937_p1 = scmp.ne.s32.totalorder %s935_s11, %s936_s7  ;;  %p942_p6 = scmp.lt.s32.totalorder %s940_s15, %s936_s7 }
  0x9a   : > { %556 = vadd.xlane.f32.xlu0 %v555_v11 }
  0x9b   : > { %v559_v13 = vsel %vm554_vm0, %v558_v12, 0.0  ;;  %p938_p2 = pnand %p937_p1, %p1090_p4  ;;  %p943_p7 = por %p942_p6, %p941_p5 }
  0x9d   : > { %p939_p3 = pneg %p938_p2 }
  0x9f   : > { %p944_p9 = pnand %p943_p7, %p939_p3 }
  0xa2   : > { %560 = vadd.xlane.f32.xlu0 %v559_v13 }
 0x10d   : > { %v557_v14 = vpop.xlane.xlu0 %556 }
 0x10e   : > { %v562_v15 = vmul.f32 0.03125, %v557_v14 }
 0x110   : > { %v564_v17 = vmul.f32 %v562_v15, %v562_v15  ;;  %v566_v27 = vsub.f32 %v553_v10, %v562_v15 }
 0x115   : > { %v561_v16 = vpop.xlane.xlu0 %560 }
 0x116   : > { %v563_v18 = vmul.f32 0.03125, %v561_v16 }
 0x118   : > { %v565_v19 = vsub.f32 %v563_v18, %v564_v17 }
 0x11a   : > { %v567_v20 = vadd.f32 1e-12, %v565_v19 }
 0x11c   : > { %906 = vrsqrt.f32 %v567_v20  ;;  %vm574_vm2 = vweird.f32 %v567_v20 }
 0x122   : > { %v907_v21 = vpop.eup %906 }
 0x123   : > { %v569_v22 = vmul.f32 %v907_v21, %v567_v20  ;;  %vm575_vm1 = vweird.f32 %v907_v21 }
 0x124   : > { %vm576_vm3 = vmor %vm574_vm2, %vm575_vm1 }
 0x125   : > { %v570_v23 = vmul.f32 %v907_v21, %v569_v22 }
 0x127   : > { %v571_v24 = vmul.f32 0.5, %v570_v23 }
 0x129   : > { %v572_v25 = vsub.f32 1.5, %v571_v24 }
 0x12b   : > { %v573_v26 = vmul.f32 %v907_v21, %v572_v25 }
 0x12d   : > { %v577_v29 = vsel %vm576_vm3, %v907_v21, %v573_v26 }
 0x12e   : > { %v578_v30 = vmul.f32 %v577_v29, %v566_v27 }
 0x130   : > { %v583_v32 = vmul.f32 %v904_v28, %v578_v30 }
 0x132   : > { %v588_v33 = vadd.f32 %v905_v31, %v583_v32 }
 0x134   : > { %589 = vst.msk [vmem:[%s185_s17] sm:$0xff] %vm554_vm0, %v588_v33 }
 0x135   : > { %947 = shalt.err (!%p944_p9)
}
 0x136   : > { %848 = dma.vmem_to_hbm [thread:$0]  (%p1090_p4), %s605_s0, 128, %s607_s28, %s591_s30  }
 0x137 PF: > { %p854_p10 = scmp.ge.s32.totalorder %s1016_s27, 2  ;;  %s618_s10 = sand.u32 1, %s996_s22  }
 0x138   : > { %s619_s12 = scalar_lea.sflag [#allocation7], %s618_s10 }
 0x139   : > { %p851_p11 = pnand %p854_p10, %p1097_p8 }
 0x13b   : > { %p852_p12 = pneg %p851_p11 }
 0x13d   : > { %991 = dma.done.wait (%p852_p12), %s619_s12, 128  }
 0x13e   : > { %993 = vsyncadd (%p852_p12), %s619_s12, 4294967168  ;;  %s26_s27 = sadd.s32 1, %s1016_s27   ;;  %s1207_s22 = smov %s1000_s23 }
 0x13f   : > { %p23_p13 = scmp.ge.s32.totalorder %s26_s27, 4   ;;  %s1208_s23 = smov %s1004_s24 }
 0x140   : > { %s1209_s24 = smov %s1103_s9  ;;  %s1210_s25 = smov %s1012_s26 }
 0x141   : > { %s1211_s26 = smov %s1213_s29  ;;  %25 = sbr.rel (!%p23_p13) target bundleno = 10 (0xa), region = 368 }
 0x146   :  { %625 = vsyncpa [#allocation7], 1 }
 0x147   :  { %627 = vsyncpa [#allocation7 + $0x1], 1 }
 0x148   :  { %628 = vsyncmov [#allocation3] }
 0x14b   :  { %s629_s6 = vpop.sfrf %628 }
 0x14c   :  { %p824_p4 = scmp.ne.s32.totalorder %s629_s6, 0 }
 0x14e   :  { %633 = shalt.err (%p824_p4)  }
 0x14f   :  { %635 = vsyncmov [#allocation3 + $0x1] }
 0x152   :  { %s636_s8 = vpop.sfrf %635 }
 0x153   :  { %p825_p8 = scmp.ne.s32.totalorder %s636_s8, 0 }
 0x155   :  { %640 = shalt.err (%p825_p8)  }
 0x156   :  { %642 = vsyncmov [#allocation3 + $0x2] }
 0x159   :  { %s643_s17 = vpop.sfrf %642 }
 0x15a   :  { %p826_p0 = scmp.ne.s32.totalorder %s643_s17, 0 }
 0x15c   :  { %647 = shalt.err (%p826_p0)  }
 0x15d   :  { %649 = vsyncmov [#allocation3 + $0x3] }
 0x160   :  { %s650_s9 = vpop.sfrf %649 }
 0x161   :  { %p827_p1 = scmp.ne.s32.totalorder %s650_s9, 0 }
 0x163   :  { %654 = shalt.err (%p827_p1)  }
 0x164   :  { %656 = vsyncmov [#allocation3 + $0x4] }
 0x167   :  { %s657_s27 = vpop.sfrf %656 }
 0x168   :  { %p828_p2 = scmp.ne.s32.totalorder %s657_s27, 0 }
 0x16a   :  { %661 = shalt.err (%p828_p2)  }
 0x16b   :  { %663 = vsyncmov [#allocation3 + $0x5] }
 0x16e   :  { %s664_s1 = vpop.sfrf %663 }
 0x16f   :  { %p829_p3 = scmp.ne.s32.totalorder %s664_s1, 0 }
 0x171   :  { %668 = shalt.err (%p829_p3)  }
 0x172   :  { %670 = vsyncmov [#allocation3 + $0x6] }
 0x175   :  { %s671_s2 = vpop.sfrf %670 }
 0x176   :  { %p830_p5 = scmp.ne.s32.totalorder %s671_s2, 0 }
 0x178   :  { %675 = shalt.err (%p830_p5)  }
 0x179   :  { %677 = vsyncmov [#allocation3 + $0x7] }
 0x17c   :  { %s678_s3 = vpop.sfrf %677 }
 0x17d   :  { %p831_p6 = scmp.ne.s32.totalorder %s678_s3, 0 }
 0x17f   :  { %682 = shalt.err (%p831_p6)  }

</bundles_post_ra>
